<compile_context>
chip_gen: v7x
topology: tpu7x:2x2x1
jax: 0.10.0
libtpu: 0.0.40
codegen_flags: <defaults>
</compile_context>

<pallas_src>
import functools

import jax
import jax.numpy as jnp
from jax.experimental import pallas as pl
from jax.experimental.pallas import tpu as pltpu


# ----------------------------------------------------------------------------
# One-time probe of pltpu.roll's rotation convention (np.roll-style or the
# inverse) so the static shift amounts used in the kernel are always correct.
# ----------------------------------------------------------------------------
def _probe_roll_is_np_style() -> bool:
    def kernel(x_ref, o_ref):
        o_ref[...] = pltpu.roll(x_ref[...], 1, axis=1)

    x = jnp.tile(jnp.arange(128, dtype=jnp.float32)[None, :], (8, 1))
    out = pl.pallas_call(
        kernel, out_shape=jax.ShapeDtypeStruct((8, 128), jnp.float32))(x)
    # np.roll-style: out[0, 0] == 127 ; inverse convention: out[0, 0] == 1
    return float(out[0, 0]) != 1.0


_ROLL_IS_NP_STYLE = _probe_roll_is_np_style()


# ----------------------------------------------------------------------------
# Fused Inception kernel. All activations are (channels, H*W) lane-dense tiles.
# ----------------------------------------------------------------------------
def _inception_kernel(x_ref, mask_ref, w1_ref, b1_ref, w2_ref, b2_ref,
                      w3_ref, b3_ref, w4a_ref, b4a_ref, w4b_ref, b4b_ref,
                      o_ref, *, H, W):
    HW = H * W
    L = HW + 128     # 128-lane zero tail: circular rolls read zeros at both
                     # out-of-image ends (|shift| <= 2*W + 2 << 128)

    # Per-column validity masks, one per horizontal tap offset (kw - pk) in -2..2.
    mrow = [mask_ref[m:m + 1, :] for m in range(5)]

    def shifted_views(v, K):
        """The K*K zero-padded 'same'-conv input views of v (C, H*W).

        Returned in (kh, kw) row-major order so stacking them along the channel
        axis matches a (K, K, Cin, Cout)-ordered weight matrix."""
        C = v.shape[0]
        pk = (K - 1) // 2
        buf = jnp.concatenate(
            [v, jnp.zeros((C, L - HW), jnp.float32)], axis=1)        # (C, L)
        views = []
        for kh in range(K):
            for kw in range(K):
                d = (kh - pk) * W + (kw - pk)    # flat spatial shift of tap
                if d == 0:
                    views.append(v)
                    continue
                shift = (-d) % L if _ROLL_IS_NP_STYLE else d % L
                rolled = pltpu.roll(buf, shift, axis=1)[:, :HW]
                if kw == pk:                     # centre column: mask all-ones
                    views.append(rolled)
                else:                            # zero the row-wrapped columns
                    views.append(rolled * mrow[kw - pk + 2])
        return views

    x = x_ref[0].astype(jnp.float32)                                # (Cin, HW)

    # ---- shared 1x1 conv (branch 2 output; also feeds branches 3 and 4) ----
    y2 = (jnp.dot(w2_ref[...], x, preferred_element_type=jnp.float32)
          + b2_ref[...])                                            # (16, HW)

    # ---- branch 1: 3x3 sum-pool (shifted VPU adds) then 1x1 (w holds 1/9) --
    pool_views = shifted_views(x, 3)
    pooled = pool_views[0]
    for vw in pool_views[1:]:
        pooled = pooled + vw
    y1 = (jnp.dot(w1_ref[...], pooled, preferred_element_type=jnp.float32)
          + b1_ref[...])                                            # (24, HW)

    # ---- branch 3: 5x5 conv on y2 as ONE im2col matmul (contraction 400) ---
    patch5 = jnp.concatenate(shifted_views(y2, 5), axis=0)          # (400, HW)
    y3 = (jnp.dot(w3_ref[...], patch5, preferred_element_type=jnp.float32)
          + b3_ref[...])                                            # (24, HW)

    # ---- branch 4: 3x3 (16 -> 20, zero-padded to 24) then 3x3 (-> 24) ------
    patch3 = jnp.concatenate(shifted_views(y2, 3), axis=0)          # (144, HW)
    y4 = (jnp.dot(w4a_ref[...], patch3, preferred_element_type=jnp.float32)
          + b4a_ref[...])                                   # (24, HW), rows 20:24 == 0
    patch3b = jnp.concatenate(shifted_views(y4, 3), axis=0)         # (216, HW)
    y4 = (jnp.dot(w4b_ref[...], patch3b, preferred_element_type=jnp.float32)
          + b4b_ref[...])                                           # (24, HW)

    # ---- lane-dense (88, HW) output slab == NCHW; 8-aligned sublane offsets -
    o_ref[0, 0:24, :] = y1.astype(o_ref.dtype)
    o_ref[0, 24:40, :] = y2.astype(o_ref.dtype)
    o_ref[0, 40:64, :] = y3.astype(o_ref.dtype)
    o_ref[0, 64:88, :] = y4.astype(o_ref.dtype)


def inception_forward(x_nchw, p):
    """Forward pass of the Inception block. Input/output in NCHW."""
    N, Cin, H, W = x_nchw.shape
    HW = H * W
    xf = x_nchw.reshape(N, Cin, HW)                   # NCHW -> (N, C, H*W), free

    f32 = jnp.float32
    # Pack parameters into matmul-ready (Cout, K*K*Cin) matrices / bias columns.
    w1 = (p["b1_w"] / 9.0).T.astype(f32)              # (24, Cin), avgpool 1/9 folded
    b1 = p["b1_b"][:, None].astype(f32)
    w2 = p["b2_w"].T.astype(f32)                      # (16, Cin), shared 1x1
    b2 = p["b2_b"][:, None].astype(f32)
    w3 = p["b3_w"].reshape(5 * 5 * 16, 24).T.astype(f32)                 # (24, 400)
    b3 = p["b3_b"][:, None].astype(f32)
    w4a = jnp.pad(p["b4_w1"].reshape(3 * 3 * 16, 20),
                  ((0, 0), (0, 4))).T.astype(f32)                        # (24, 144)
    b4a = jnp.pad(p["b4_b1"], (0, 4))[:, None].astype(f32)               # (24, 1)
    w4b = jnp.pad(p["b4_w2"], ((0, 0), (0, 0), (0, 4), (0, 0))
                  ).reshape(3 * 3 * 24, 24).T.astype(f32)                # (24, 216)
    b4b = p["b4_b2"][:, None].astype(f32)

    # Per-column validity masks for horizontal tap offsets -2..+2.
    wcol = jnp.arange(HW, dtype=jnp.int32) % W                           # (HW,)
    off = jnp.arange(5, dtype=jnp.int32)[:, None] - 2                    # (5, 1)
    mask = ((wcol[None, :] + off >= 0) &
            (wcol[None, :] + off < W)).astype(f32)                       # (5, HW)

    kernel = functools.partial(_inception_kernel, H=H, W=W)
    rep = lambda n: (0, 0)           # weights/masks: same block for every image

    out = pl.pallas_call(
        kernel,
        out_shape=jax.ShapeDtypeStruct((N, 88, HW), x_nchw.dtype),
        grid=(N,),
        in_specs=[
            pl.BlockSpec((1, Cin, HW), lambda n: (n, 0, 0)),
            pl.BlockSpec((5, HW), rep),
            pl.BlockSpec((24, Cin), rep), pl.BlockSpec((24, 1), rep),
            pl.BlockSpec((16, Cin), rep), pl.BlockSpec((16, 1), rep),
            pl.BlockSpec((24, 400), rep), pl.BlockSpec((24, 1), rep),
            pl.BlockSpec((24, 144), rep), pl.BlockSpec((24, 1), rep),
            pl.BlockSpec((24, 216), rep), pl.BlockSpec((24, 1), rep),
        ],
        out_specs=pl.BlockSpec((1, 88, HW), lambda n: (n, 0, 0)),
        compiler_params=pltpu.CompilerParams(
            dimension_semantics=("parallel",)),
    )(xf, mask, w1, b1, w2, b2, w3, b3, w4a, b4a, w4b, b4b)

    return out.reshape(N, 88, H, W)                   # free trailing-dim reshape


def init_params(key, inchannel):
    ks = jax.random.split(key, 10)

    def w(k, shape, fan_in):
        return jax.random.normal(k, shape, jnp.float32) / jnp.sqrt(float(fan_in))

    def b(k, n):
        return 0.01 * jax.random.normal(k, (n,), jnp.float32)

    return {
        "b1_w": w(ks[0], (inchannel, 24), inchannel),       # 1x1 after avgpool
        "b1_b": b(ks[1], 24),
        "b2_w": w(ks[2], (inchannel, 16), inchannel),       # shared 1x1
        "b2_b": b(ks[3], 16),
        "b3_w": w(ks[4], (5, 5, 16, 24), 16 * 25),
        "b3_b": b(ks[5], 24),
        "b4_w1": w(ks[6], (3, 3, 16, 20), 16 * 9),
        "b4_b1": b(ks[7], 20),
        "b4_w2": w(ks[8], (3, 3, 20, 24), 20 * 9),
        "b4_b2": b(ks[9], 24),
    }


def reference_forward(x_nchw, p):
    """Pure-JAX reference (mirrors the PyTorch ops directly)."""
    x = jnp.transpose(x_nchw, (0, 2, 3, 1))

    def conv(inp, w, bias, pad):
        y = jax.lax.conv_general_dilated(
            inp, w, (1, 1), ((pad, pad), (pad, pad)),
            dimension_numbers=("NHWC", "HWIO", "NHWC"),
            precision=jax.lax.Precision.HIGHEST)
        return y + bias

    pooled = jax.lax.reduce_window(
        x, 0.0, jax.lax.add, (1, 3, 3, 1), (1, 1, 1, 1),
        ((0, 0), (1, 1), (1, 1), (0, 0))) / 9.0           # count_include_pad=True
    y1 = conv(pooled, p["b1_w"][None, None], p["b1_b"], 0)
    y2 = conv(x, p["b2_w"][None, None], p["b2_b"], 0)
    y3 = conv(y2, p["b3_w"], p["b3_b"], 2)
    y4 = conv(conv(y2, p["b4_w1"], p["b4_b1"], 1), p["b4_w2"], p["b4_b2"], 1)
    out = jnp.concatenate([y1, y2, y3, y4], axis=-1)
    return jnp.transpose(out, (0, 3, 1, 2))


if __name__ == "__main__":
    key = jax.random.PRNGKey(0)
    kx, kp = jax.random.split(key)

    N, C, H, W = 2, 4, 16, 16                 # NCHW, like the PyTorch module input
    x = jax.random.normal(kx, (N, C, H, W), jnp.float32)
    params = init_params(kp, C)

    out = jax.jit(inception_forward)(x, params)
    out = jax.block_until_ready(out)

    assert out.shape == (N, 88, H, W), out.shape
    assert out.dtype == jnp.float32

    ref = reference_forward(x, params)
    assert jnp.allclose(out, ref, atol=1e-2, rtol=1e-2), float(
        jnp.max(jnp.abs(out - ref)))

    print("KERNEL_OK")
</pallas_src>

<mosaic_0001>
module attributes {stable_mosaic.version = 11 : i64} {
  func.func @kernel(%arg0: memref<8x128xf32, #tpu.memory_space<vmem>>, %arg1: memref<8x128xf32, #tpu.memory_space<vmem>>) attributes {dimension_semantics = [], scalar_prefetch = 0 : i64, scratch_operands = 0 : i64, tpu.core_type = #tpu.core_type<tc>} {
    %c0 = arith.constant 0 : index
    %c0_0 = arith.constant 0 : index
    %0 = vector.load %arg0[%c0, %c0_0] : memref<8x128xf32, #tpu.memory_space<vmem>>, vector<8x128xf32>
    %c1_i32 = arith.constant 1 : i32
    %1 = tpu.dynamic_rotate %0 by %c1_i32 dim 1 : vector<8x128xf32>, i32 -> vector<8x128xf32>
    %c0_1 = arith.constant 0 : index
    %c0_2 = arith.constant 0 : index
    %2 = vector.load %arg1[%c0_1, %c0_2] : memref<8x128xf32, #tpu.memory_space<vmem>>, vector<8x128xf32>
    tpu.vector_store %arg1[%c0_1, %c0_2], %1 {strides = array<i32>} : memref<8x128xf32, #tpu.memory_space<vmem>>, vector<8x128xf32>,
    return
  }
}

</mosaic_0001>

<bundles_post_ra>
// kernel: tpu_custom_call.1
= control target key start
LH: loop header
LB: loop body
LE: loop exit
PB: predicated region body
PF: predicated region fallthrough
CT: control target
= control target key end

     0   :  { %6 = vsyncpa [#allocation3], 0  ;;  %s128_s0 = inlined_call_operand.hbm [shape: f32[8,128], index: 0, kind: input, shape index: {}]   ;;  %s129_s1 = inlined_call_operand.hbm [shape: f32[8,128], index: 1, kind: output, shape index: {}]  }
   0x1   :  { %7 = vsyncpa [#allocation4], 0  ;;  %s91_s6 = smov [#allocation2]   ;;  %s43_s10 = scalar_lea.hbm %s128_s0, 128 }
   0x2   :  { %s14_s7 = sshll.u32 %s91_s6, 4  ;;  %p44_p0 = scmp.ne.s32.totalorder %s128_s0, %s43_s10  ;;  %s15_s7 = int_to_ptr.vmem [resolvable:$true] %s14_s7 }
   0x3   :  { %p47_p1 = scmp.lt.u32.totalorder %s43_s10, %s128_s0 }
   0x5   :  { %p49_p2 = pnand %p47_p1, %p44_p0 }
   0x7   :  { %52 = shalt.err (!%p49_p2)
}
   0x8   :  { %s53_s15 = scalar_lea.vmem %s15_s7, 128  ;;  %p58_p4 = scmp.lt.s32.totalorder %s15_s7, %s15_s7 }
   0x9   :  { %p54_p3 = scmp.ne.s32.totalorder %s15_s7, %s53_s15  ;;  %p59_p5 = scmp.lt.s32.totalorder %s53_s15, %s53_s15 }
   0xb   :  { %p60_p6 = por %p59_p5, %p58_p4 }
   0xd   :  { %p61_p7 = pnand %p60_p6, %p54_p3 }
   0xf   :  { %64 = shalt.err (!%p61_p7)
}
  0x10   :  { %17 = dma.hbm_to_vmem [thread:$0]  %s128_s0, 128, %s15_s7, [#allocation3]  }
  0x11   :  { %87 = dma.done.wait [#allocation3], 128  }
  0x12   :  { %88 = vsyncadd [#allocation3], 4294967168  ;;  %v21_v0 = vld [vmem:[#allocation2] sm:$0xff]  ;;  %s92_s18 = smov 1   ;;  %s93_s19 = smov [#allocation5]  }
  0x13   :  { %22 = vrot.lane.b32.xlu0 %v21_v0, %s92_s18  ;;  %s31_s20 = sshll.u32 %s93_s19, 4  ;;  %s32_s20 = int_to_ptr.vmem [resolvable:$true] %s31_s20 }
  0x14   :  { %s65_s21 = scalar_lea.vmem %s32_s20, 128  ;;  %p70_p9 = scmp.lt.s32.totalorder %s32_s20, %s32_s20 }
  0x15   :  { %p66_p8 = scmp.ne.s32.totalorder %s32_s20, %s65_s21  ;;  %p71_p10 = scmp.lt.s32.totalorder %s65_s21, %s65_s21 }
  0x17   :  { %p72_p11 = por %p71_p10, %p70_p9 }
  0x19   :  { %p73_p12 = pnand %p72_p11, %p66_p8 }
  0x85   :  { %v23_v1 = vpop.permute.xlu0 %22 }
  0x86   :  { %24 = vst [vmem:[#allocation5] sm:$0xff] %v23_v1 }
  0x87   :  { %76 = shalt.err (!%p73_p12)
}
  0x88   :  { %s77_s0 = scalar_lea.hbm %s129_s1, 128 }
  0x89   :  { %p78_p13 = scmp.ne.s32.totalorder %s129_s1, %s77_s0  ;;  %p81_p0 = scmp.lt.u32.totalorder %s77_s0, %s129_s1 }
  0x8b   :  { %p83_p1 = pnand %p81_p0, %p78_p13 }
  0x8d   :  { %86 = shalt.err (!%p83_p1)
}
  0x8e   :  { %34 = dma.vmem_to_hbm [thread:$0]  %s32_s20, 128, %s129_s1, [#allocation4]  }
  0x8f   :  { %89 = dma.done.wait [#allocation4], 128  }
  0x90   :  { %90 = vsyncadd [#allocation4], 4294967168 }
  0x91   :  { %38 = vsyncpa [#allocation3], 1 }
  0x92   :  { %39 = vsyncpa [#allocation4], 1 }

</bundles_post_ra>
